<compile_context>
chip_gen: v5e
topology: v5e:2x2
jax: 0.10.0
libtpu: 0.0.40
codegen_flags: <defaults>
</compile_context>

<pallas_src>
import jax
import jax.numpy as jnp
from jax.experimental import pallas as pl
from jax.experimental.pallas import tpu as pltpu


def _conv1x1_add_kernel(w_ref, b_ref, x_ref, other_ref, out_ref):
    # w_ref:     SMEM (Cout*Cin,) f32   conv weight, row-major (o, c)
    # b_ref:     SMEM (Cout,)     f32   conv bias
    # x_ref:     VMEM (Nb, Cin,  Rb, 128)
    # other_ref: VMEM (Nb, Cout, Rb, 128)
    # out_ref:   VMEM (Nb, Cout, Rb, 128)
    nb = x_ref.shape[0]
    cin = x_ref.shape[1]
    cout = other_ref.shape[1]
    for n in range(nb):                       # fully unrolled: small static bounds
        for o in range(cout):
            acc = other_ref[n, o].astype(jnp.float32) + b_ref[o]
            for c in range(cin):
                acc = acc + x_ref[n, c].astype(jnp.float32) * w_ref[o * cin + c]
            # Dense (Rb, 128) slab -> plain unmasked vst, no relayout.
            out_ref[n, o] = acc.astype(out_ref.dtype)


def _plan_tiles(N, HW, cin, cout, itemsize):
    """Choose (Nb, Rb, rows_total): batch block, row block, padded row count."""
    try:
        vmem_cap = pltpu.get_tpu_info().vmem_capacity_bytes
    except Exception:  # pragma: no cover - conservative fallback (v7x-sized)
        vmem_cap = 64 << 20
    # Per-grid-step budget; keep double-buffered blocks well under scoped VMEM.
    budget = max(1 << 20, min(vmem_cap // 8, 8 << 20))

    rows_needed = -(-HW // 128)                              # ceil(HW / 128)
    # x + other + out blocks per row of 128 lanes, times 2 for double buffering.
    bytes_per_row = (cin + 2 * cout) * 128 * itemsize * 2
    rows_budget = max(1, budget // bytes_per_row)

    if rows_needed <= rows_budget:
        Rb = rows_needed                                     # full image per tile
        rows_total = rows_needed
    else:
        Rb = max(8, (rows_budget // 8) * 8)                  # multiple of 8 sublanes
        rows_total = -(-rows_needed // Rb) * Rb              # pad rows to tile size

    n_row_tiles = rows_total // Rb

    # Single-image, single-tile problems: split rows so both v7x TCs get work.
    if N == 1 and n_row_tiles == 1 and rows_total >= 16 and rows_total % 16 == 0:
        Rb = rows_total // 2
        n_row_tiles = 2

    # Group batch images per block to amortize per-step overhead, but keep at
    # least 2 grid steps along the batch axis.
    Nb = 1
    if n_row_tiles == 1 and N > 1:
        for cand in range(2, N // 2 + 1):
            if N % cand == 0 and cand * Rb * bytes_per_row <= budget:
                Nb = cand

    return Nb, Rb, rows_total


def conv1x1_add(x_nchw, other_nchw, weight, bias):
    """x_nchw: (N, Cin, H, W), other_nchw: (N, Cout, H, W),
    weight: (Cout, Cin, 1, 1) [PyTorch conv layout], bias: (Cout,)."""
    N, Cin, H, W = x_nchw.shape
    Cout = weight.shape[0]
    HW = H * W
    out_dtype = other_nchw.dtype
    itemsize = max(jnp.dtype(x_nchw.dtype).itemsize, jnp.dtype(out_dtype).itemsize)

    Nb, Rb, rows_total = _plan_tiles(N, HW, Cin, Cout, itemsize)
    HW_pad = rows_total * 128

    # Free, contiguous reshape; pad spatial to the tile granularity (zeros).
    x3 = x_nchw.reshape(N, Cin, HW)
    other3 = other_nchw.reshape(N, Cout, HW)
    if HW_pad != HW:
        pad = HW_pad - HW
        x3 = jnp.pad(x3, ((0, 0), (0, 0), (0, pad)))
        other3 = jnp.pad(other3, ((0, 0), (0, 0), (0, pad)))
    x4 = x3.reshape(N, Cin, rows_total, 128)
    other4 = other3.reshape(N, Cout, rows_total, 128)

    w_flat = weight.reshape(Cout * Cin).astype(jnp.float32)   # row-major (o, c)
    b_flat = bias.reshape(Cout).astype(jnp.float32)

    grid = (N // Nb, rows_total // Rb)

    out4 = pl.pallas_call(
        _conv1x1_add_kernel,
        out_shape=jax.ShapeDtypeStruct((N, Cout, rows_total, 128), out_dtype),
        grid_spec=pltpu.PrefetchScalarGridSpec(
            num_scalar_prefetch=0,
            grid=grid,
            in_specs=[
                pl.BlockSpec(memory_space=pltpu.MemorySpace.SMEM),   # weight scalars
                pl.BlockSpec(memory_space=pltpu.MemorySpace.SMEM),   # bias scalars
                pl.BlockSpec((Nb, Cin, Rb, 128), lambda n, s: (n, 0, s, 0)),
                pl.BlockSpec((Nb, Cout, Rb, 128), lambda n, s: (n, 0, s, 0)),
            ],
            out_specs=pl.BlockSpec((Nb, Cout, Rb, 128), lambda n, s: (n, 0, s, 0)),
        ),
        compiler_params=pltpu.CompilerParams(
            dimension_semantics=("parallel", "parallel")),
    )(w_flat, b_flat, x4, other4)

    out3 = out4.reshape(N, Cout, HW_pad)
    if HW_pad != HW:
        out3 = out3[:, :, :HW]
    return out3.reshape(N, Cout, H, W)


if __name__ == "__main__":
    key = jax.random.PRNGKey(0)
    k_x, k_o, k_w, k_b = jax.random.split(key, 4)

    # Small shapes consistent with the module: Conv2d(2 -> 4, 1x1).
    N, Cin, Cout, H, W = 2, 2, 4, 16, 16
    x1 = jax.random.normal(k_x, (N, Cin, H, W), dtype=jnp.float32)
    other = jax.random.normal(k_o, (N, Cout, H, W), dtype=jnp.float32)

    # Deterministic parameter init (synthetic, not a checkpoint).
    weight = jax.random.normal(k_w, (Cout, Cin, 1, 1), dtype=jnp.float32) * 0.1
    bias = jax.random.normal(k_b, (Cout,), dtype=jnp.float32) * 0.1

    out = conv1x1_add(x1, other, weight, bias)
    out = jax.block_until_ready(out)

    # Reference check in plain JAX (same math as the PyTorch forward).
    ref = (
        jnp.einsum("nchw,oc->nohw", x1, weight.reshape(Cout, Cin))
        + bias.reshape(1, Cout, 1, 1)
        + other
    )
    assert out.shape == (N, Cout, H, W)
    assert jnp.allclose(out, ref, atol=1e-5, rtol=1e-5)

    print("KERNEL_OK")
</pallas_src>

<mosaic_0001>
module attributes {stable_mosaic.version = 11 : i64} {
  func.func @_conv1x1_add_kernel(%arg0: i32, %arg1: i32, %arg2: memref<8xf32, #tpu.memory_space<smem>>, %arg3: memref<4xf32, #tpu.memory_space<smem>>, %arg4: memref<1x2x2x128xf32, #tpu.memory_space<vmem>>, %arg5: memref<1x4x2x128xf32, #tpu.memory_space<vmem>>, %arg6: memref<1x4x2x128xf32, #tpu.memory_space<vmem>>) attributes {dimension_semantics = [#tpu.dimension_semantics<parallel>, #tpu.dimension_semantics<parallel>], iteration_bounds = array<i64: 2, 1>, scalar_prefetch = 0 : i64, scratch_operands = 0 : i64, tpu.core_type = #tpu.core_type<tc>, window_params = [{transform_indices = @transform_0, window_bounds = array<i64: 8>}, {transform_indices = @transform_1, window_bounds = array<i64: 4>}, {transform_indices = @transform_2, window_bounds = array<i64: 1, 2, 2, 128>}, {transform_indices = @transform_3, window_bounds = array<i64: 1, 4, 2, 128>}, {transform_indices = @transform_4, window_bounds = array<i64: 1, 4, 2, 128>}]} {
    %c0 = arith.constant 0 : index
    %c0_0 = arith.constant 0 : index
    %c0_1 = arith.constant 0 : index
    %c0_2 = arith.constant 0 : index
    %0 = vector.load %arg5[%c0, %c0_0, %c0_1, %c0_2] : memref<1x4x2x128xf32, #tpu.memory_space<vmem>>, vector<1x1x2x128xf32>
    %1 = vector.shape_cast %0 : vector<1x1x2x128xf32> to vector<2x128xf32>
    %c0_3 = arith.constant 0 : index
    %2 = memref.load %arg3[%c0_3] : memref<4xf32, #tpu.memory_space<smem>>
    %3 = vector.broadcast %2 : f32 to vector<2x128xf32>
    %4 = arith.addf %1, %3 : vector<2x128xf32>
    %c0_4 = arith.constant 0 : index
    %c0_5 = arith.constant 0 : index
    %c0_6 = arith.constant 0 : index
    %c0_7 = arith.constant 0 : index
    %5 = vector.load %arg4[%c0_4, %c0_5, %c0_6, %c0_7] : memref<1x2x2x128xf32, #tpu.memory_space<vmem>>, vector<1x1x2x128xf32>
    %6 = vector.shape_cast %5 : vector<1x1x2x128xf32> to vector<2x128xf32>
    %c0_8 = arith.constant 0 : index
    %7 = memref.load %arg2[%c0_8] : memref<8xf32, #tpu.memory_space<smem>>
    %8 = vector.broadcast %7 : f32 to vector<2x128xf32>
    %9 = arith.mulf %6, %8 : vector<2x128xf32>
    %10 = arith.addf %4, %9 : vector<2x128xf32>
    %c0_9 = arith.constant 0 : index
    %c1 = arith.constant 1 : index
    %c0_10 = arith.constant 0 : index
    %c0_11 = arith.constant 0 : index
    %11 = vector.load %arg4[%c0_9, %c1, %c0_10, %c0_11] : memref<1x2x2x128xf32, #tpu.memory_space<vmem>>, vector<1x1x2x128xf32>
    %12 = vector.shape_cast %11 : vector<1x1x2x128xf32> to vector<2x128xf32>
    %c1_12 = arith.constant 1 : index
    %13 = memref.load %arg2[%c1_12] : memref<8xf32, #tpu.memory_space<smem>>
    %14 = vector.broadcast %13 : f32 to vector<2x128xf32>
    %15 = arith.mulf %12, %14 : vector<2x128xf32>
    %16 = arith.addf %10, %15 : vector<2x128xf32>
    %c0_13 = arith.constant 0 : index
    %c0_14 = arith.constant 0 : index
    %c0_15 = arith.constant 0 : index
    %c0_16 = arith.constant 0 : index
    %17 = vector.load %arg6[%c0_13, %c0_14, %c0_15, %c0_16] : memref<1x4x2x128xf32, #tpu.memory_space<vmem>>, vector<1x1x2x128xf32>
    %18 = vector.shape_cast %17 : vector<1x1x2x128xf32> to vector<2x128xf32>
    %19 = vector.shape_cast %16 : vector<2x128xf32> to vector<1x1x2x128xf32>
    tpu.vector_store %arg6[%c0_13, %c0_14, %c0_15, %c0_16], %19 {strides = array<i32>} : memref<1x4x2x128xf32, #tpu.memory_space<vmem>>, vector<1x1x2x128xf32>,
    %c0_17 = arith.constant 0 : index
    %c1_18 = arith.constant 1 : index
    %c0_19 = arith.constant 0 : index
    %c0_20 = arith.constant 0 : index
    %20 = vector.load %arg5[%c0_17, %c1_18, %c0_19, %c0_20] : memref<1x4x2x128xf32, #tpu.memory_space<vmem>>, vector<1x1x2x128xf32>
    %21 = vector.shape_cast %20 : vector<1x1x2x128xf32> to vector<2x128xf32>
    %c1_21 = arith.constant 1 : index
    %22 = memref.load %arg3[%c1_21] : memref<4xf32, #tpu.memory_space<smem>>
    %23 = vector.broadcast %22 : f32 to vector<2x128xf32>
    %24 = arith.addf %21, %23 : vector<2x128xf32>
    %c0_22 = arith.constant 0 : index
    %c0_23 = arith.constant 0 : index
    %c0_24 = arith.constant 0 : index
    %c0_25 = arith.constant 0 : index
    %25 = vector.load %arg4[%c0_22, %c0_23, %c0_24, %c0_25] : memref<1x2x2x128xf32, #tpu.memory_space<vmem>>, vector<1x1x2x128xf32>
    %26 = vector.shape_cast %25 : vector<1x1x2x128xf32> to vector<2x128xf32>
    %c2 = arith.constant 2 : index
    %27 = memref.load %arg2[%c2] : memref<8xf32, #tpu.memory_space<smem>>
    %28 = vector.broadcast %27 : f32 to vector<2x128xf32>
    %29 = arith.mulf %26, %28 : vector<2x128xf32>
    %30 = arith.addf %24, %29 : vector<2x128xf32>
    %c0_26 = arith.constant 0 : index
    %c1_27 = arith.constant 1 : index
    %c0_28 = arith.constant 0 : index
    %c0_29 = arith.constant 0 : index
    %31 = vector.load %arg4[%c0_26, %c1_27, %c0_28, %c0_29] : memref<1x2x2x128xf32, #tpu.memory_space<vmem>>, vector<1x1x2x128xf32>
    %32 = vector.shape_cast %31 : vector<1x1x2x128xf32> to vector<2x128xf32>
    %c3 = arith.constant 3 : index
    %33 = memref.load %arg2[%c3] : memref<8xf32, #tpu.memory_space<smem>>
    %34 = vector.broadcast %33 : f32 to vector<2x128xf32>
    %35 = arith.mulf %32, %34 : vector<2x128xf32>
    %36 = arith.addf %30, %35 : vector<2x128xf32>
    %c0_30 = arith.constant 0 : index
    %c1_31 = arith.constant 1 : index
    %c0_32 = arith.constant 0 : index
    %c0_33 = arith.constant 0 : index
    %37 = vector.load %arg6[%c0_30, %c1_31, %c0_32, %c0_33] : memref<1x4x2x128xf32, #tpu.memory_space<vmem>>, vector<1x1x2x128xf32>
    %38 = vector.shape_cast %37 : vector<1x1x2x128xf32> to vector<2x128xf32>
    %39 = vector.shape_cast %36 : vector<2x128xf32> to vector<1x1x2x128xf32>
    tpu.vector_store %arg6[%c0_30, %c1_31, %c0_32, %c0_33], %39 {strides = array<i32>} : memref<1x4x2x128xf32, #tpu.memory_space<vmem>>, vector<1x1x2x128xf32>,
    %c0_34 = arith.constant 0 : index
    %c2_35 = arith.constant 2 : index
    %c0_36 = arith.constant 0 : index
    %c0_37 = arith.constant 0 : index
    %40 = vector.load %arg5[%c0_34, %c2_35, %c0_36, %c0_37] : memref<1x4x2x128xf32, #tpu.memory_space<vmem>>, vector<1x1x2x128xf32>
    %41 = vector.shape_cast %40 : vector<1x1x2x128xf32> to vector<2x128xf32>
    %c2_38 = arith.constant 2 : index
    %42 = memref.load %arg3[%c2_38] : memref<4xf32, #tpu.memory_space<smem>>
    %43 = vector.broadcast %42 : f32 to vector<2x128xf32>
    %44 = arith.addf %41, %43 : vector<2x128xf32>
    %c0_39 = arith.constant 0 : index
    %c0_40 = arith.constant 0 : index
    %c0_41 = arith.constant 0 : index
    %c0_42 = arith.constant 0 : index
    %45 = vector.load %arg4[%c0_39, %c0_40, %c0_41, %c0_42] : memref<1x2x2x128xf32, #tpu.memory_space<vmem>>, vector<1x1x2x128xf32>
    %46 = vector.shape_cast %45 : vector<1x1x2x128xf32> to vector<2x128xf32>
    %c4 = arith.constant 4 : index
    %47 = memref.load %arg2[%c4] : memref<8xf32, #tpu.memory_space<smem>>
    %48 = vector.broadcast %47 : f32 to vector<2x128xf32>
    %49 = arith.mulf %46, %48 : vector<2x128xf32>
    %50 = arith.addf %44, %49 : vector<2x128xf32>
    %c0_43 = arith.constant 0 : index
    %c1_44 = arith.constant 1 : index
    %c0_45 = arith.constant 0 : index
    %c0_46 = arith.constant 0 : index
    %51 = vector.load %arg4[%c0_43, %c1_44, %c0_45, %c0_46] : memref<1x2x2x128xf32, #tpu.memory_space<vmem>>, vector<1x1x2x128xf32>
    %52 = vector.shape_cast %51 : vector<1x1x2x128xf32> to vector<2x128xf32>
    %c5 = arith.constant 5 : index
    %53 = memref.load %arg2[%c5] : memref<8xf32, #tpu.memory_space<smem>>
    %54 = vector.broadcast %53 : f32 to vector<2x128xf32>
    %55 = arith.mulf %52, %54 : vector<2x128xf32>
    %56 = arith.addf %50, %55 : vector<2x128xf32>
    %c0_47 = arith.constant 0 : index
    %c2_48 = arith.constant 2 : index
    %c0_49 = arith.constant 0 : index
    %c0_50 = arith.constant 0 : index
    %57 = vector.load %arg6[%c0_47, %c2_48, %c0_49, %c0_50] : memref<1x4x2x128xf32, #tpu.memory_space<vmem>>, vector<1x1x2x128xf32>
    %58 = vector.shape_cast %57 : vector<1x1x2x128xf32> to vector<2x128xf32>
    %59 = vector.shape_cast %56 : vector<2x128xf32> to vector<1x1x2x128xf32>
    tpu.vector_store %arg6[%c0_47, %c2_48, %c0_49, %c0_50], %59 {strides = array<i32>} : memref<1x4x2x128xf32, #tpu.memory_space<vmem>>, vector<1x1x2x128xf32>,
    %c0_51 = arith.constant 0 : index
    %c3_52 = arith.constant 3 : index
    %c0_53 = arith.constant 0 : index
    %c0_54 = arith.constant 0 : index
    %60 = vector.load %arg5[%c0_51, %c3_52, %c0_53, %c0_54] : memref<1x4x2x128xf32, #tpu.memory_space<vmem>>, vector<1x1x2x128xf32>
    %61 = vector.shape_cast %60 : vector<1x1x2x128xf32> to vector<2x128xf32>
    %c3_55 = arith.constant 3 : index
    %62 = memref.load %arg3[%c3_55] : memref<4xf32, #tpu.memory_space<smem>>
    %63 = vector.broadcast %62 : f32 to vector<2x128xf32>
    %64 = arith.addf %61, %63 : vector<2x128xf32>
    %c0_56 = arith.constant 0 : index
    %c0_57 = arith.constant 0 : index
    %c0_58 = arith.constant 0 : index
    %c0_59 = arith.constant 0 : index
    %65 = vector.load %arg4[%c0_56, %c0_57, %c0_58, %c0_59] : memref<1x2x2x128xf32, #tpu.memory_space<vmem>>, vector<1x1x2x128xf32>
    %66 = vector.shape_cast %65 : vector<1x1x2x128xf32> to vector<2x128xf32>
    %c6 = arith.constant 6 : index
    %67 = memref.load %arg2[%c6] : memref<8xf32, #tpu.memory_space<smem>>
    %68 = vector.broadcast %67 : f32 to vector<2x128xf32>
    %69 = arith.mulf %66, %68 : vector<2x128xf32>
    %70 = arith.addf %64, %69 : vector<2x128xf32>
    %c0_60 = arith.constant 0 : index
    %c1_61 = arith.constant 1 : index
    %c0_62 = arith.constant 0 : index
    %c0_63 = arith.constant 0 : index
    %71 = vector.load %arg4[%c0_60, %c1_61, %c0_62, %c0_63] : memref<1x2x2x128xf32, #tpu.memory_space<vmem>>, vector<1x1x2x128xf32>
    %72 = vector.shape_cast %71 : vector<1x1x2x128xf32> to vector<2x128xf32>
    %c7 = arith.constant 7 : index
    %73 = memref.load %arg2[%c7] : memref<8xf32, #tpu.memory_space<smem>>
    %74 = vector.broadcast %73 : f32 to vector<2x128xf32>
    %75 = arith.mulf %72, %74 : vector<2x128xf32>
    %76 = arith.addf %70, %75 : vector<2x128xf32>
    %c0_64 = arith.constant 0 : index
    %c3_65 = arith.constant 3 : index
    %c0_66 = arith.constant 0 : index
    %c0_67 = arith.constant 0 : index
    %77 = vector.load %arg6[%c0_64, %c3_65, %c0_66, %c0_67] : memref<1x4x2x128xf32, #tpu.memory_space<vmem>>, vector<1x1x2x128xf32>
    %78 = vector.shape_cast %77 : vector<1x1x2x128xf32> to vector<2x128xf32>
    %79 = vector.shape_cast %76 : vector<2x128xf32> to vector<1x1x2x128xf32>
    tpu.vector_store %arg6[%c0_64, %c3_65, %c0_66, %c0_67], %79 {strides = array<i32>} : memref<1x4x2x128xf32, #tpu.memory_space<vmem>>, vector<1x1x2x128xf32>,
    return
  }
  func.func @transform_0(%arg0: i32, %arg1: i32) -> i32 {
    %c0_i32 = arith.constant 0 : i32
    %c0_i32_0 = arith.constant 0 : i32
    return %c0_i32 : i32
  }
  func.func @transform_1(%arg0: i32, %arg1: i32) -> i32 {
    %c0_i32 = arith.constant 0 : i32
    %c0_i32_0 = arith.constant 0 : i32
    return %c0_i32 : i32
  }
  func.func @transform_2(%arg0: i32, %arg1: i32) -> (i32, i32, i32, i32) {
    %c0_i32 = arith.constant 0 : i32
    %c0_i32_0 = arith.constant 0 : i32
    %c0_i32_1 = arith.constant 0 : i32
    return %arg0, %c0_i32, %arg1, %c0_i32_0 : i32, i32, i32, i32
  }
  func.func @transform_3(%arg0: i32, %arg1: i32) -> (i32, i32, i32, i32) {
    %c0_i32 = arith.constant 0 : i32
    %c0_i32_0 = arith.constant 0 : i32
    %c0_i32_1 = arith.constant 0 : i32
    return %arg0, %c0_i32, %arg1, %c0_i32_0 : i32, i32, i32, i32
  }
  func.func @transform_4(%arg0: i32, %arg1: i32) -> (i32, i32, i32, i32) {
    %c0_i32 = arith.constant 0 : i32
    %c0_i32_0 = arith.constant 0 : i32
    %c0_i32_1 = arith.constant 0 : i32
    return %arg0, %c0_i32, %arg1, %c0_i32_0 : i32, i32, i32, i32
  }
}

</mosaic_0001>

<bundles_post_ra>
// kernel: tpu_custom_call.1
= control target key start
LH: loop header
LB: loop body
LE: loop exit
PB: predicated region body
PF: predicated region fallthrough
CT: control target
= control target key end

     0   :  { %s1080_s0 = inlined_call_operand.hbm [shape: f32[8], index: 0, kind: input, shape index: {}]   ;;  %s1081_s1 = inlined_call_operand.hbm [shape: f32[4], index: 1, kind: input, shape index: {}]   ;;  %s1082_s2 = inlined_call_operand.hbm [shape: f32[2,2,2,128], index: 2, kind: input, shape index: {}]   ;;  %s1083_s3 = inlined_call_operand.hbm [shape: f32[2,4,2,128], index: 3, kind: input, shape index: {}]   ;;  %s1084_s4 = inlined_call_operand.hbm [shape: f32[2,4,2,128], index: 4, kind: output, shape index: {}]  }
   0x1   :  { %1086 = sst [smem:[#allocation18_spill]] %s1080_s0 }
   0x2   :  { %1087 = sst [smem:[#allocation19_spill]] %s1081_s1 }
   0x3   :  { %1088 = sst [smem:[#allocation20_spill]] %s1082_s2 }
   0x4   :  { %9 = vsyncpa [#allocation5], 0 }
   0x5   :  { %10 = vsyncpa [#allocation7], 0 }
   0x6   :  { %11 = vsyncpa [#allocation3], 0 }
   0x7   :  { %13 = vsyncpa [#allocation3 + $0x1], 0 }
   0x8   :  { %14 = vsyncpa [#allocation10], 0 }
   0x9   :  { %16 = vsyncpa [#allocation10 + $0x1], 0 }
   0xa   :  { %17 = vsyncpa [#allocation4], 0 }
   0xb   :  { %19 = vsyncpa [#allocation4 + $0x1], 0  ;;  %s878_s15 = smov 0   ;;  %s880_s16 = smov 0  }
   0xc   :  { %s882_s17 = smov 0   ;;  %s884_s18 = smov 0  }
   0xd   :  { %s886_s19 = smov 0   ;;  %s888_s20 = smov 0  }
   0xe LB: > { %s523_s21 = sadd.s32 4294967295, %s845_s20   ;;  %s524_s22 = sadd.s32 4294967294, %s845_s20   ;;  %s845_s20 = sphi %s888_s20, %s25_s20   ;;  %s841_s19 = sphi %s886_s19, %s1105_s19   ;;  %s837_s18 = sphi %s884_s18, %s1104_s18   ;;  %s833_s17 = sphi %s882_s17, %s1103_s17   ;;  %s829_s16 = sphi %s880_s16, %s1102_s16   ;;  %s825_s15 = sphi %s878_s15, %s1101_s15  }
   0xf   : > { %s88_s23 = sadd.s32 1, %s833_s17  ;;  %p95_p0 = scmp.ne.s32.totalorder %s833_s17, %s829_s16 }
  0x10   : > { %p96_p1 = scmp.eq.s32.totalorder %s845_s20, 0  ;;  %p101_p2 = scmp.ne.s32.totalorder %s829_s16, %s825_s15 }
  0x11   : > { %p916_p3 = scmp.eq.s32.totalorder %s523_s21, 0  ;;  %p155_p4 = scmp.eq.s32.totalorder %s523_s21, 1 }
  0x12   : > { %p920_p5 = por %p96_p1, %p95_p0  ;;  %p161_p6 = scmp.eq.s32.totalorder %s524_s22, 1 }
  0x13   : > { %p926_p7 = por %p916_p3, %p101_p2  ;;  %p930_p8 = por %p155_p4, %p95_p0 }
  0x14   : > { %p934_p9 = por %p161_p6, %p101_p2  ;;  %p525_p10 = scmp.ge.s32.totalorder %s845_s20, 1 }
  0x15   : > { %p168_p11 = scmp.lt.s32.totalorder %s845_s20, 3  ;;  %s1094_s0 = sld [smem:[#allocation18_spill]] }
  0x16   : > { %p528_p13 = scmp.ge.s32.totalorder %s845_s20, 2  ;;  %p603_p0 = scmp.lt.s32.totalorder %s845_s20, 2 }
  0x17   : > { %p943_p12 = pnand %p525_p10, %p168_p11  ;;  %s1096_s1 = sld [smem:[#allocation19_spill]] }
  0x18   : > { %p956_p2 = pnand %p603_p0, %p920_p5  ;;  %s847_s11 = smov [#allocation2]  }
  0x19   : > { %p583_p1 = pneg %p943_p12  ;;  %s848_s12 = smov [#allocation6]  }
  0x1a   : > { %s37_s13 = sadd.s32 1, %s841_s19  ;;  %s964_s14 = sand.u32 1, %s833_s17  }
  0x1b   : > { %s180_s5 = sshll.u32 %s1094_s0, 4  ;;  %p584_p4 = pnand %p583_p1, %p916_p3  ;;  %s181_s5 = int_to_ptr.hbm [resolvable:$true] %s180_s5 }
  0x1c   : > { %p39_p6 = scmp.ge.s32.totalorder %s37_s13, 2  ;;  %s529_s21 = sshll.u32 %s964_s14, 2 }
  0x1d   : > { %s190_s9 = sshll.u32 %s1096_s1, 4  ;;  %s566_s22 = sshll.u32 %s841_s19, 2  ;;  %s191_s9 = int_to_ptr.hbm [resolvable:$true] %s190_s9 }
  0x1e   : > { %586 = dma.hbm_to_smem (!%p584_p4), %s181_s5, 16, %s847_s11, [#allocation5]  }
  0x1f   : > { %589 = dma.hbm_to_smem (!%p584_p4), %s191_s9, 16, %s848_s12, [#allocation7]  }
  0x20   : > { %s1107_s13 = smov (%p39_p6, %s37_s13), 0  ;;  %s1099_s2 = sld [smem:[#allocation20_spill]] }
  0x21   : > { %1098 = sst [smem:[#allocation17_spill]] %s1107_s13  ;;  %s83_s5 = ssub.s32 %s841_s19, %s1107_s13 }
  0x22   : > { %p86_p5 = scmp.eq.s32.totalorder %s83_s5, 0  ;;  %s205_s8 = scalar_lea.vmem [#allocation8], %s529_s21 }
  0x23   : > { %s214_s9 = sshll.u32 %s205_s8, 4  ;;  %s202_s12 = scalar_lea.sflag [#allocation3], %s964_s14  ;;  %s215_s9 = int_to_ptr.vmem [resolvable:$true] %s214_s9 }
  0x24   : > { %s978_s11 = scalar_select %p86_p5, %s833_s17, %s88_s23  }
  0x25   : > { %s849_s0 = smov 32   ;;  %s850_s1 = smov 2  }
  0x26   : > { %s211_s30 = scalar_lea.hbm %s1099_s2, %s566_s22  ;;  %s532_s25 = sshll.u32 %s964_s14, 3 }
  0x27   : > { %s212_s7 = sshll.u32 %s211_s30, 4  ;;  %s567_s29 = sshll.u32 %s841_s19, 3  ;;  %s213_s7 = int_to_ptr.hbm [resolvable:$true] %s212_s7 }
  0x28   : > { %593 = dma.hbm_to_vmem [thread:$0]  (!%p956_p2), %s213_s7, 64, %s215_s9, %s202_s12, %s849_s0, %s849_s0, %s850_s1  }
  0x29   : > { %s234_s30 = scalar_lea.hbm %s1083_s3, %s567_s29  ;;  %s228_s5 = scalar_lea.vmem [#allocation9], %s532_s25 }
  0x2a   : > { %s237_s21 = sshll.u32 %s228_s5, 4  ;;  %s235_s13 = sshll.u32 %s234_s30, 4  ;;  %s238_s21 = int_to_ptr.vmem [resolvable:$true] %s237_s21  ;;  %s236_s13 = int_to_ptr.hbm [resolvable:$true] %s235_s13 }
  0x2b   : > { %s225_s8 = scalar_lea.sflag [#allocation10], %s964_s14  ;;  %249 = sbr.rel (%p943_p12) target bundleno = 87 (0x57), region = 36 }
  0x2c   : > { %596 = dma.hbm_to_vmem [thread:$0]  (!%p956_p2), %s236_s13, 128, %s238_s21, %s225_s8, %s849_s0, %s849_s0, %s850_s1  }
  0x30   : > { %804 = dma.done.wait (%p916_p3), [#allocation5], 16  }
  0x31   : > { %806 = vsyncadd (%p916_p3), [#allocation5], 4294967280 }
  0x32   : > { %808 = dma.done.wait (%p916_p3), [#allocation7], 16  }
  0x33   : > { %810 = vsyncadd (%p916_p3), [#allocation7], 4294967280  ;;  %s1002_s2 = sand.u32 1, %s829_s16  }
  0x34   : > { %s538_s0 = sshll.u32 %s1002_s2, 2  ;;  %s262_s1 = scalar_lea.sflag [#allocation3], %s1002_s2 }
  0x35   : > { %s1006_s23 = scalar_lea.vmem [#allocation8], %s538_s0 }
  0x36   : > { %812 = dma.done.wait (%p926_p7), %s262_s1, 64  }
  0x37   : > { %814 = vsyncadd (%p926_p7), %s262_s1, 4294967232  ;;  %s539_s24 = sshll.u32 %s1002_s2, 3  ;;  %s272_s6 = scalar_lea.sflag [#allocation10], %s1002_s2 }
  0x38   : > { %s1016_s10 = scalar_lea.vmem [#allocation9], %s539_s24 }
  0x39   : > { %816 = dma.done.wait (%p926_p7), %s272_s6, 128  }
  0x3a   : > { %818 = vsyncadd (%p926_p7), %s272_s6, 4294967168 }
  0x3b   : > { %281 = sfence }
  0x3c   : > { %s308_s13 = sld [smem:[#allocation6]]  ;;  %v307_v0 = vld [vmem:[%s1016_s10] sm:$0x3]  ;;  %v311_v1 = vld [vmem:[%s1006_s23] sm:$0x3]  ;;  %s568_s8 = sshll.u32 %s837_s18, 3 }
  0x3d   : > { %s312_s14 = sld [smem:[#allocation2]]  ;;  %v541_v3 = vld [vmem:[%s1006_s23 + $0x2] sm:$0x3]  ;;  %v543_v6 = vld [vmem:[%s1016_s10 + $0x2] sm:$0x3]  ;;  %s306_s0 = scalar_lea.vmem [#allocation11], %s539_s24 }
  0x3e   : > { %s542_s7 = sld [smem:[#allocation2 + $0x1]]  ;;  %v328_v9 = vld [vmem:[%s1006_s23] sm:$0x3]  ;;  %v546_v12 = vld [vmem:[%s1006_s23 + $0x2] sm:$0x3]  ;;  %s387_s18 = scalar_lea.hbm %s1084_s4, %s568_s8 }
  0x3f   : > { %s544_s9 = sld [smem:[#allocation6 + $0x1]]  ;;  %v549_v16 = vld [vmem:[%s1016_s10 + $0x4] sm:$0x3]  ;;  %v345_v19 = vld [vmem:[%s1006_s23] sm:$0x3]  ;;  %s390_s24 = sshll.u32 %s387_s18, 4  ;;  %s391_s24 = int_to_ptr.hbm [resolvable:$true] %s390_s24 }
  0x40   : > { %s545_s12 = sld [smem:[#allocation2 + $0x2]]  ;;  %v552_v23 = vld [vmem:[%s1006_s23 + $0x2] sm:$0x3]  ;;  %v555_v27 = vld [vmem:[%s1016_s10 + $0x6] sm:$0x3]  ;;  %s375_s10 = scalar_lea.sflag [#allocation4], %s1002_s2 }
  0x41   : > { %s547_s25 = sld [smem:[#allocation2 + $0x3]]  ;;  %v362_v30 = vld [vmem:[%s1006_s23] sm:$0x3]  ;;  %v558_v34 = vld [vmem:[%s1006_s23 + $0x2] sm:$0x3]  ;;  %s765_s23 = sshra.s32 %s391_s24, 4  ;;  %s766_s23 = int_to_ptr.hbm [resolvable:$true] %s765_s23 }
  0x42   : > { %v309_v2 = vstv %s308_s13  ;;  %s550_s29 = sld [smem:[#allocation6 + $0x2]]  ;;  %s388_s13 = sshll.u32 %s306_s0, 4  ;;  %s389_s13 = int_to_ptr.vmem [resolvable:$true] %s388_s13 }
  0x43   : > { %v310_v4 = vadd.f32 %v309_v2, %v307_v0  ;;  %v313_v5 = vstv %s312_s14  ;;  %s551_s26 = sld [smem:[#allocation2 + $0x4]]  ;;  %s767_s14 = scalar_lea.hbm %s766_s23, 8 }
  0x44   : > { %v314_v7 = vmul.f32 %v313_v5, %v311_v1  ;;  %v319_v8 = vstv %s542_s7  ;;  %s1027_s22 = sld [smem:[#allocation2 + $0x5]]  ;;  %p768_p3 = scmp.ne.s32.totalorder %s766_s23, %s767_s14 }
  0x45   : > { %v320_v10 = vmul.f32 %v541_v3, %v319_v8  ;;  %v326_v11 = vstv %s544_s9  ;;  %s1030_s30 = sld [smem:[#allocation6 + $0x3]]  ;;  %p772_p11 = scmp.lt.s32.totalorder %s766_s23, %s1084_s4 }
  0x46   : > { %v315_v13 = vadd.f32 %v314_v7, %v310_v4  ;;  %v327_v14 = vadd.f32 %v543_v6, %v326_v11  ;;  %v330_v15 = vstv %s545_s12  ;;  %s557_s5 = sld [smem:[#allocation2 + $0x6]]  ;;  %p769_p7 = pnand %p768_p3, %p930_p8 }
  0x47   : > { %v331_v17 = vmul.f32 %v330_v15, %v328_v9  ;;  %v335_v18 = vstv %s547_s25  ;;  %s559_s21 = sld [smem:[#allocation2 + $0x7]]  ;;  %s771_s12 = scalar_lea.hbm %s1084_s4, 16 }
  0x48   : > { %v321_v20 = vadd.f32 %v320_v10, %v315_v13  ;;  %v336_v21 = vmul.f32 %v546_v12, %v335_v18  ;;  %v343_v22 = vstv %s550_s29  ;;  %p770_p10 = pneg %p769_p7  ;;  %p773_p12 = scmp.lt.s32.totalorder %s771_s12, %s767_s14 }
  0x49   : > { %v332_v24 = vadd.f32 %v331_v17, %v327_v14  ;;  %v344_v25 = vadd.f32 %v549_v16, %v343_v22  ;;  %v347_v26 = vstv %s551_s26 }
  0x4a   : > { %322 = vst [vmem:[%s306_s0] sm:$0x3] %v321_v20  ;;  %v348_v28 = vmul.f32 %v347_v26, %v345_v19  ;;  %v352_v29 = vstv %s1027_s22  ;;  %p774_p0 = por %p773_p12, %p772_p11 }
  0x4b   : > { %v337_v31 = vadd.f32 %v336_v21, %v332_v24  ;;  %v353_v32 = vmul.f32 %v552_v23, %v352_v29  ;;  %v360_v33 = vstv %s1030_s30 }
  0x4c   : > { %v349_v35 = vadd.f32 %v348_v28, %v344_v25  ;;  %v361_v36 = vadd.f32 %v555_v27, %v360_v33  ;;  %v364_v37 = vstv %s557_s5  ;;  %p775_p1 = pnand %p774_p0, %p770_p10 }
  0x4d   : > { %548 = vst [vmem:[%s306_s0 + $0x2] sm:$0x3] %v337_v31  ;;  %v365_v38 = vmul.f32 %v364_v37, %v362_v30  ;;  %v369_v39 = vstv %s559_s21 }
  0x4e   : > { %v354_v40 = vadd.f32 %v353_v32, %v349_v35  ;;  %v370_v41 = vmul.f32 %v558_v34, %v369_v39 }
  0x4f   : > { %v366_v42 = vadd.f32 %v365_v38, %v361_v36 }
  0x50   : > { %554 = vst [vmem:[%s306_s0 + $0x4] sm:$0x3] %v354_v40 }
  0x51   : > { %v371_v43 = vadd.f32 %v370_v41, %v366_v42 }
  0x53   : > { %560 = vst [vmem:[%s306_s0 + $0x6] sm:$0x3] %v371_v43 }
  0x54   : > { %778 = shalt.err (!%p775_p1)
}
  0x55   : > { %s851_s2 = smov 32   ;;  %s852_s26 = smov 2  }
  0x56   : > { %581 = dma.vmem_to_hbm [thread:$0]  (%p930_p8), %s389_s13, 128, %s391_s24, %s375_s10, %s851_s2, %s851_s2, %s852_s26  }
  0x57 PF: > { %s405_s22 = sand.u32 1, %s825_s15   ;;  %p598_p2 = pnand %p528_p13, %p934_p9 }
  0x58   : > { %s406_s30 = scalar_lea.sflag [#allocation4], %s405_s22 }
  0x59   : > { %p599_p4 = pneg %p598_p2 }
  0x5b   : > { %820 = dma.done.wait (%p599_p4), %s406_s30, 128  }
  0x5c   : > { %822 = vsyncadd (%p599_p4), %s406_s30, 4294967168  ;;  %s25_s20 = sadd.s32 1, %s845_s20   ;;  %s1100_s27 = sld [smem:[#allocation17_spill]] }
  0x5d   : > { %p22_p6 = scmp.ge.s32.totalorder %s25_s20, 4   ;;  %s1101_s15 = smov %s829_s16 }
  0x5e   : > { %s1102_s16 = smov %s833_s17  ;;  %s1103_s17 = smov %s978_s11 }
  0x5f   : > { %s1104_s18 = smov %s841_s19  ;;  %24 = sbr.rel (!%p22_p6) target bundleno = 14 (0xe), region = 110 }
  0x62   : > { %s1105_s19 = smov %s1100_s27 }
  0x64   :  { %412 = vsyncpa [#allocation3], 1 }
  0x65   :  { %414 = vsyncpa [#allocation3 + $0x1], 1 }
  0x66   :  { %415 = vsyncpa [#allocation10], 1 }
  0x67   :  { %417 = vsyncpa [#allocation10 + $0x1], 1 }
  0x68   :  { %418 = vsyncpa [#allocation4], 1 }
  0x69   :  { %420 = vsyncpa [#allocation4 + $0x1], 1 }
  0x6a   :  { %421 = vsyncpa [#allocation5], 1 }
  0x6b   :  { %423 = vsyncpa [#allocation5 + $0x1], 1 }
  0x6c   :  { %424 = vsyncpa [#allocation7], 1 }

</bundles_post_ra>
